<compile_context>
chip_gen: v7x
topology: tpu7x:2x2x1
jax: 0.10.0
libtpu: 0.0.40
codegen_flags: <defaults>
</compile_context>

<pallas_src>
import jax
import jax.numpy as jnp
from jax.experimental import pallas as pl
from jax.experimental.pallas import tpu as pltpu

EPS = 1e-5


# ----------------------------- kernels --------------------------------------


def normact_fused_kernel(x_ref, gamma_ref, beta_ref, o_ref):
    # x_ref: (N, TC, L) -- full N and L extents, so in-block per-channel stats
    # are the exact batch statistics.  gamma_ref/beta_ref: (TC, 1) f32.
    x = x_ref[...].astype(jnp.float32)
    n, _, l = x.shape
    inv_m = 1.0 / float(n * l)

    # One-pass statistics (no centered block-sized temporary).
    s = jnp.sum(jnp.sum(x, axis=0), axis=-1, keepdims=True)        # (TC, 1)
    ss = jnp.sum(jnp.sum(x * x, axis=0), axis=-1, keepdims=True)   # (TC, 1)
    mean = s * inv_m
    var = jnp.maximum(ss * inv_m - mean * mean, 0.0)
    inv_std = jax.lax.rsqrt(var + EPS)

    # Fold normalization + affine into one scale/bias per channel.
    scale = gamma_ref[...] * inv_std                                # (TC, 1)
    bias = beta_ref[...] - mean * scale                             # (TC, 1)

    y = x * scale[None, :, :] + bias[None, :, :]
    o_ref[...] = jnp.maximum(y, 0.0).astype(o_ref.dtype)


def normact_stats_kernel(x_ref, sum_ref, sumsq_ref):
    # Grid = (channel tiles, batch tiles); batch axis is the reduction axis
    # (marked "arbitrary"); sum/sumsq output blocks are resident accumulators.
    @pl.when(pl.program_id(1) == 0)
    def _init():
        sum_ref[...] = jnp.zeros_like(sum_ref)
        sumsq_ref[...] = jnp.zeros_like(sumsq_ref)

    x = x_ref[...].astype(jnp.float32)                              # (TN, TC, L)
    sum_ref[...] += jnp.sum(jnp.sum(x, axis=0), axis=-1, keepdims=True)
    sumsq_ref[...] += jnp.sum(jnp.sum(x * x, axis=0), axis=-1, keepdims=True)


def normact_apply_kernel(x_ref, scale_ref, bias_ref, o_ref):
    x = x_ref[...].astype(jnp.float32)                              # (TN, TC, L)
    y = x * scale_ref[...][None, :, :] + bias_ref[...][None, :, :]
    o_ref[...] = jnp.maximum(y, 0.0).astype(o_ref.dtype)


# ------------------------- budget / tiling helpers ---------------------------


def _vmem_budget():
    """Return (max_block_bytes, vmem_limit_bytes), sized per TPU generation."""
    cap = 64 * 1024 * 1024  # conservative default: v7x has only 64 MiB physical
    try:
        info = pltpu.get_tpu_info()
        cap = int(getattr(info, "vmem_capacity_bytes", cap)) or cap
    except Exception:
        pass
    if cap >= 100 * 1024 * 1024:
        # v5e / v6e: 128 MiB VMEM -> bigger blocks, fewer grid-step overheads.
        return 16 * 1024 * 1024, 96 * 1024 * 1024
    # v7x: 64 MiB physical -> keep double-buffered blocks + temporaries well under.
    return 8 * 1024 * 1024, 56 * 1024 * 1024


def _pick_channel_tile(C, N, L, max_block_bytes):
    """Largest channel tile TC (multiple of 8, dividing C, capped at C//2 so
    the grid has >= 2 steps for megacore) whose (N, TC, L) f32 block fits the
    budget.  Small / odd C falls back to one full-C block (always legal)."""
    if C % 8 != 0 or C < 16:
        return C
    bytes_per_channel = N * L * 4
    cap = C // 2                       # guarantee >= 2 grid steps (v7x megacore)
    best = 8
    tc = 8
    while tc <= cap:
        if C % tc == 0 and tc * bytes_per_channel <= max_block_bytes:
            best = tc
        tc += 8
    return best


def _pick_batch_tile(N, per_batch_bytes, max_block_bytes):
    """Largest batch tile TN dividing N with TN * per_batch_bytes in budget."""
    best = 1
    for tn in range(1, N + 1):
        if N % tn == 0 and tn * per_batch_bytes <= max_block_bytes:
            best = tn
    return best


# ------------------------------- wrappers ------------------------------------


def _norm_act_fused(x, g2d, b2d, TC, vmem_limit):
    N, C, L = x.shape
    grid = (C // TC,)
    return pl.pallas_call(
        normact_fused_kernel,
        out_shape=jax.ShapeDtypeStruct((N, C, L), x.dtype),
        grid=grid,
        in_specs=[
            pl.BlockSpec((N, TC, L), lambda c: (0, c, 0)),
            pl.BlockSpec((TC, 1), lambda c: (c, 0)),
            pl.BlockSpec((TC, 1), lambda c: (c, 0)),
        ],
        out_specs=pl.BlockSpec((N, TC, L), lambda c: (0, c, 0)),
        compiler_params=pltpu.CompilerParams(
            dimension_semantics=("parallel",),   # shard channel tiles across TCs
            vmem_limit_bytes=vmem_limit,
        ),
        cost_estimate=pl.CostEstimate(
            flops=7 * x.size,
            transcendentals=C,
            bytes_accessed=2 * x.size * x.dtype.itemsize + 4 * C * 4,
        ),
    )(x, g2d, b2d)


def _norm_act_two_pass(x, g2d, b2d, TC, max_block_bytes, vmem_limit):
    """Fallback when a full-(N, L) channel block does not fit the VMEM budget:
    pass 1 accumulates per-channel sum/sumsq over batch tiles, pass 2 applies
    the folded scale/bias.  Costs one extra read of x (still bandwidth-near-
    optimal) but keeps every block bounded."""
    N, C, L = x.shape
    TN = _pick_batch_tile(N, TC * L * 4, max_block_bytes)
    grid = (C // TC, N // TN)

    x_spec = pl.BlockSpec((TN, TC, L), lambda c, n: (n, c, 0))
    vec_spec = pl.BlockSpec((TC, 1), lambda c, n: (c, 0))

    s, ss = pl.pallas_call(
        normact_stats_kernel,
        out_shape=(jax.ShapeDtypeStruct((C, 1), jnp.float32),
                   jax.ShapeDtypeStruct((C, 1), jnp.float32)),
        grid=grid,
        in_specs=[x_spec],
        out_specs=(vec_spec, vec_spec),
        compiler_params=pltpu.CompilerParams(
            dimension_semantics=("parallel", "arbitrary"),
            vmem_limit_bytes=vmem_limit,
        ),
    )(x)

    inv_m = 1.0 / float(N * L)
    mean = s * inv_m
    var = jnp.maximum(ss * inv_m - mean * mean, 0.0)
    scale = g2d * jax.lax.rsqrt(var + EPS)   # (C, 1)
    bias = b2d - mean * scale                # (C, 1)

    return pl.pallas_call(
        normact_apply_kernel,
        out_shape=jax.ShapeDtypeStruct((N, C, L), x.dtype),
        grid=grid,
        in_specs=[x_spec, vec_spec, vec_spec],
        out_specs=x_spec,
        compiler_params=pltpu.CompilerParams(
            dimension_semantics=("parallel", "parallel"),
            vmem_limit_bytes=vmem_limit,
        ),
        cost_estimate=pl.CostEstimate(
            flops=3 * x.size,
            transcendentals=0,
            bytes_accessed=2 * x.size * x.dtype.itemsize + 2 * C * 4,
        ),
    )(x, scale, bias)


def norm_act(x_ncl, gamma, beta, *, max_block_bytes=None, vmem_limit_bytes=None):
    """x_ncl: (N, C, L); gamma, beta: (C,).  I/O dtype preserved; math in f32."""
    N, C, L = x_ncl.shape
    auto_block, auto_limit = _vmem_budget()
    if max_block_bytes is None:
        max_block_bytes = auto_block
    vmem_limit = auto_limit if vmem_limit_bytes is None else vmem_limit_bytes

    g2d = gamma.reshape(C, 1).astype(jnp.float32)
    b2d = beta.reshape(C, 1).astype(jnp.float32)

    TC = _pick_channel_tile(C, N, L, max_block_bytes)
    if N * TC * L * 4 <= max_block_bytes:
        return _norm_act_fused(x_ncl, g2d, b2d, TC, vmem_limit)
    return _norm_act_two_pass(x_ncl, g2d, b2d, TC, max_block_bytes, vmem_limit)


def norm_act_ref(x_ncl, gamma, beta):
    mean = jnp.mean(x_ncl, axis=(0, 2), keepdims=True)
    var = jnp.mean((x_ncl - mean) ** 2, axis=(0, 2), keepdims=True)
    y = (x_ncl - mean) / jnp.sqrt(var + EPS)
    y = y * gamma[None, :, None] + beta[None, :, None]
    return jnp.maximum(y, 0.0)


if __name__ == "__main__":
    key = jax.random.PRNGKey(0)
    kx, kg, kb, kx2, kg2, kb2 = jax.random.split(key, 6)

    # Case 1: small (N, C, L) consistent with the module's BatchNorm1d input.
    N, C, L = 2, 4, 16
    x = jax.random.normal(kx, (N, C, L), dtype=jnp.float32)
    gamma = 1.0 + 0.1 * jax.random.normal(kg, (C,), dtype=jnp.float32)
    beta = 0.1 * jax.random.normal(kb, (C,), dtype=jnp.float32)
    y = norm_act(x, gamma, beta)
    jax.block_until_ready(y)
    assert y.shape == (N, C, L)
    assert jnp.allclose(y, norm_act_ref(x, gamma, beta), atol=1e-4, rtol=1e-4), \
        "mismatch vs reference (small)"

    # Case 2: multi-block channel grid (TC=8 -> grid=(2,)), lane-dense L.
    N2, C2, L2 = 4, 16, 256
    x2 = jax.random.normal(kx2, (N2, C2, L2), dtype=jnp.float32)
    gamma2 = 1.0 + 0.1 * jax.random.normal(kg2, (C2,), dtype=jnp.float32)
    beta2 = 0.1 * jax.random.normal(kb2, (C2,), dtype=jnp.float32)
    y2 = norm_act(x2, gamma2, beta2, max_block_bytes=8 * N2 * L2 * 4)
    jax.block_until_ready(y2)
    assert jnp.allclose(y2, norm_act_ref(x2, gamma2, beta2), atol=1e-4, rtol=1e-4), \
        "mismatch vs reference (tiled fused)"

    # Case 3: force the two-pass (stats + apply) fallback used when even the
    # smallest fused block would exceed the VMEM budget (huge N*L on v7x).
    y3 = norm_act(x2, gamma2, beta2, max_block_bytes=4 * N2 * L2 * 4)
    jax.block_until_ready(y3)
    assert jnp.allclose(y3, norm_act_ref(x2, gamma2, beta2), atol=1e-4, rtol=1e-4), \
        "mismatch vs reference (two-pass)"

    print("KERNEL_OK")
</pallas_src>

<mosaic_0001>
module attributes {stable_mosaic.version = 11 : i64} {
  func.func @normact_fused_kernel(%arg0: i32, %arg1: memref<2x4x16xf32, #tpu.memory_space<vmem>>, %arg2: memref<4x1xf32, #tpu.memory_space<vmem>>, %arg3: memref<4x1xf32, #tpu.memory_space<vmem>>, %arg4: memref<2x4x16xf32, #tpu.memory_space<vmem>>) attributes {dimension_semantics = [#tpu.dimension_semantics<parallel>], iteration_bounds = array<i64: 1>, scalar_prefetch = 0 : i64, scratch_operands = 0 : i64, tpu.core_type = #tpu.core_type<tc>, window_params = [{transform_indices = @transform_0, window_bounds = array<i64: 2, 4, 16>}, {transform_indices = @transform_1, window_bounds = array<i64: 4, 1>}, {transform_indices = @transform_2, window_bounds = array<i64: 4, 1>}, {transform_indices = @transform_3, window_bounds = array<i64: 2, 4, 16>}]} {
    %c0 = arith.constant 0 : index
    %c0_0 = arith.constant 0 : index
    %c0_1 = arith.constant 0 : index
    %0 = vector.load %arg1[%c0, %c0_0, %c0_1] : memref<2x4x16xf32, #tpu.memory_space<vmem>>, vector<2x4x16xf32>
    %cst = arith.constant dense<0.000000e+00> : vector<4x16xf32>
    %1 = vector.multi_reduction <add>, %0, %cst [0] : vector<2x4x16xf32> to vector<4x16xf32>
    %cst_2 = arith.constant dense<0.000000e+00> : vector<4xf32>
    %2 = vector.multi_reduction <add>, %1, %cst_2 [1] : vector<4x16xf32> to vector<4xf32>
    %3 = vector.shape_cast %2 : vector<4xf32> to vector<4x1xf32>
    %4 = arith.mulf %0, %0 : vector<2x4x16xf32>
    %cst_3 = arith.constant dense<0.000000e+00> : vector<4x16xf32>
    %5 = vector.multi_reduction <add>, %4, %cst_3 [0] : vector<2x4x16xf32> to vector<4x16xf32>
    %cst_4 = arith.constant dense<0.000000e+00> : vector<4xf32>
    %6 = vector.multi_reduction <add>, %5, %cst_4 [1] : vector<4x16xf32> to vector<4xf32>
    %7 = vector.shape_cast %6 : vector<4xf32> to vector<4x1xf32>
    %cst_5 = arith.constant 3.125000e-02 : f32
    %8 = vector.broadcast %cst_5 : f32 to vector<4x1xf32>
    %9 = arith.mulf %3, %8 : vector<4x1xf32>
    %cst_6 = arith.constant 3.125000e-02 : f32
    %10 = vector.broadcast %cst_6 : f32 to vector<4x1xf32>
    %11 = arith.mulf %7, %10 : vector<4x1xf32>
    %12 = arith.mulf %9, %9 : vector<4x1xf32>
    %13 = arith.subf %11, %12 : vector<4x1xf32>
    %cst_7 = arith.constant 0.000000e+00 : f32
    %14 = vector.broadcast %cst_7 : f32 to vector<4x1xf32>
    %15 = arith.maximumf %13, %14 : vector<4x1xf32>
    %cst_8 = arith.constant 9.99999974E-6 : f32
    %16 = vector.broadcast %cst_8 : f32 to vector<4x1xf32>
    %17 = arith.addf %15, %16 : vector<4x1xf32>
    %18 = math.rsqrt %17 : vector<4x1xf32>
    %c0_9 = arith.constant 0 : index
    %c0_10 = arith.constant 0 : index
    %19 = vector.load %arg2[%c0_9, %c0_10] : memref<4x1xf32, #tpu.memory_space<vmem>>, vector<4x1xf32>
    %20 = arith.mulf %19, %18 : vector<4x1xf32>
    %c0_11 = arith.constant 0 : index
    %c0_12 = arith.constant 0 : index
    %21 = vector.load %arg3[%c0_11, %c0_12] : memref<4x1xf32, #tpu.memory_space<vmem>>, vector<4x1xf32>
    %22 = arith.mulf %9, %20 : vector<4x1xf32>
    %23 = arith.subf %21, %22 : vector<4x1xf32>
    %24 = vector.shape_cast %20 : vector<4x1xf32> to vector<1x4x1xf32>
    %25 = vector.broadcast %24 : vector<1x4x1xf32> to vector<2x4x16xf32>
    %26 = arith.mulf %0, %25 : vector<2x4x16xf32>
    %27 = vector.shape_cast %23 : vector<4x1xf32> to vector<1x4x1xf32>
    %28 = vector.broadcast %27 : vector<1x4x1xf32> to vector<2x4x16xf32>
    %29 = arith.addf %26, %28 : vector<2x4x16xf32>
    %cst_13 = arith.constant 0.000000e+00 : f32
    %30 = vector.broadcast %cst_13 : f32 to vector<2x4x16xf32>
    %31 = arith.maximumf %29, %30 : vector<2x4x16xf32>
    %c0_14 = arith.constant 0 : index
    %c0_15 = arith.constant 0 : index
    %c0_16 = arith.constant 0 : index
    %32 = vector.load %arg4[%c0_14, %c0_15, %c0_16] : memref<2x4x16xf32, #tpu.memory_space<vmem>>, vector<2x4x16xf32>
    tpu.vector_store %arg4[%c0_14, %c0_15, %c0_16], %31 {strides = array<i32>} : memref<2x4x16xf32, #tpu.memory_space<vmem>>, vector<2x4x16xf32>,
    return
  }
  func.func @transform_0(%arg0: i32) -> (i32, i32, i32) {
    %c0_i32 = arith.constant 0 : i32
    %c0_i32_0 = arith.constant 0 : i32
    %c0_i32_1 = arith.constant 0 : i32
    return %c0_i32, %arg0, %c0_i32_0 : i32, i32, i32
  }
  func.func @transform_1(%arg0: i32) -> (i32, i32) {
    %c0_i32 = arith.constant 0 : i32
    %c0_i32_0 = arith.constant 0 : i32
    return %arg0, %c0_i32 : i32, i32
  }
  func.func @transform_2(%arg0: i32) -> (i32, i32) {
    %c0_i32 = arith.constant 0 : i32
    %c0_i32_0 = arith.constant 0 : i32
    return %arg0, %c0_i32 : i32, i32
  }
  func.func @transform_3(%arg0: i32) -> (i32, i32, i32) {
    %c0_i32 = arith.constant 0 : i32
    %c0_i32_0 = arith.constant 0 : i32
    %c0_i32_1 = arith.constant 0 : i32
    return %c0_i32, %arg0, %c0_i32_0 : i32, i32, i32
  }
}

</mosaic_0001>

<bundles_post_ra>
// kernel: tpu_custom_call.1
= control target key start
LH: loop header
LB: loop body
LE: loop exit
PB: predicated region body
PF: predicated region fallthrough
CT: control target
= control target key end

     0   :  { %vm17_vm0 = vcmask 125952   ;;  %s166_s0 = inlined_call_operand.vmem [shape: f32[2,4,16], index: 0, kind: input, shape index: {}]   ;;  %s167_s1 = inlined_call_operand.vmem [shape: f32[4,1], index: 1, kind: input, shape index: {}]   ;;  %s168_s2 = inlined_call_operand.vmem [shape: f32[4,1], index: 2, kind: input, shape index: {}]   ;;  %s169_s3 = inlined_call_operand.hbm [shape: f32[2,4,16], index: 3, kind: output, shape index: {}]  }
   0x1   :  { %v15_v0 = vld [vmem:[%s166_s0] sm:$0xf]  ;;  %v16_v1 = vld [vmem:[%s166_s0 + $0x4] sm:$0xf] }
   0x2   :  { %v18_v2 = vsel %vm17_vm0, %v15_v0, 0.0  ;;  %v19_v3 = vsel %vm17_vm0, %v16_v1, 0.0  ;;  %v24_v4 = vmul.f32 %v15_v0, %v15_v0  ;;  %v25_v5 = vmul.f32 %v16_v1, %v16_v1 }
   0x3   :  { %8 = vsyncpa [#allocation3], 0  ;;  %v20_v6 = vadd.f32 %v19_v3, %v18_v2  ;;  %v110_v12 = vmov 0   ;;  %v39_v21 = vld [vmem:[%s167_s1] sm:$0xf]  ;;  %s111_s19 = smov [#allocation2]  }
   0x4   :  { %v26_v7 = vsel %vm17_vm0, %v24_v4, 0.0  ;;  %v27_v8 = vsel %vm17_vm0, %v25_v5, 0.0  ;;  %82 = vset.pattern.permute.xlu1 %v110_v12  ;;  %83 = vset.pattern.permute.xlu0 %v110_v12  ;;  %v41_v24 = vld [vmem:[%s168_s2] sm:$0xf]  ;;  %s67_s20 = sshll.u32 %s111_s19, 4  ;;  %s68_s20 = int_to_ptr.vmem [resolvable:$true] %s67_s20 }
   0x5   :  { %v21_v9 = vsel %vm17_vm0, %v20_v6, 0.0  ;;  %v28_v10 = vadd.f32 %v27_v8, %v26_v7  ;;  %s86_s1 = scalar_lea.vmem %s68_s20, 128  ;;  %p91_p1 = scmp.lt.s32.totalorder %s68_s20, %s68_s20 }
   0x6   :  { %22 = vadd.xlane.f32.xlu0 %v21_v9  ;;  %p87_p0 = scmp.ne.s32.totalorder %s68_s20, %s86_s1  ;;  %p92_p2 = scmp.lt.s32.totalorder %s86_s1, %s86_s1 }
   0x7   :  { %v29_v11 = vsel %vm17_vm0, %v28_v10, 0.0 }
   0x8   :  { %p93_p3 = por %p92_p2, %p91_p1 }
   0xa   :  { %30 = vadd.xlane.f32.xlu0 %v29_v11  ;;  %p94_p4 = pnand %p93_p3, %p87_p0 }
  0x93   :  { %v23_v13 = vpop.xlane.xlu0 %22 }
  0x94   :  { %v32_v14 = vmul.f32 0.03125, %v23_v13 }
  0x96   :  { %v34_v16 = vmul.f32 %v32_v14, %v32_v14 }
  0x97   :  { %v31_v15 = vpop.xlane.xlu0 %30 }
  0x98   :  { %v33_v17 = vmul.f32 0.03125, %v31_v15 }
  0x9a   :  { %v35_v18 = vsub.f32 %v33_v17, %v34_v16 }
  0x9c   :  { %v36_v19 = vmax.f32 %v35_v18, 0.0 }
  0x9e   :  { %v37_v20 = vadd.f32 1e-05, %v36_v19 }
  0xa0   :  { %84 = vrsqrt.f32 %v37_v20 }
  0xaa   :  { %v85_v22 = vpop.eup %84 }
  0xab   :  { %v40_v23 = vmul.f32 %v85_v22, %v39_v21 }
  0xad   :  { %46 = vperm.xlu1 %82, %v40_v23   ;;  %v42_v25 = vmul.f32 %v40_v23, %v32_v14 }
  0xaf   :  { %v43_v26 = vsub.f32 %v41_v24, %v42_v25 }
  0xb1   :  { %53 = vperm.xlu1 %82, %v43_v26  }
 0x12c   :  { %v47_v27 = vpop.permute.xlu1 %46 }
 0x12d   :  { %v49_v28 = vmul.f32 %v47_v27, %v15_v0  ;;  %v50_v29 = vmul.f32 %v47_v27, %v16_v1 }
 0x130   :  { %v54_v30 = vpop.permute.xlu1 %53 }
 0x131   :  { %v56_v31 = vadd.f32 %v54_v30, %v49_v28  ;;  %v57_v32 = vadd.f32 %v54_v30, %v50_v29 }
 0x133   :  { %v58_v33 = vmax.f32 %v56_v31, 0.0  ;;  %v59_v34 = vmax.f32 %v57_v32, 0.0 }
 0x135   :  { %60 = vst.msk [vmem:[#allocation2] sm:$0xf] %vm17_vm0, %v58_v33  ;;  %61 = vst.msk [vmem:[#allocation2 + $0x4] sm:$0xf] %vm17_vm0, %v59_v34 }
 0x136   :  { %97 = shalt.err (!%p94_p4)
}
 0x137   :  { %s98_s22 = scalar_lea.hbm %s169_s3, 128 }
 0x138   :  { %p99_p5 = scmp.ne.s32.totalorder %s169_s3, %s98_s22  ;;  %p102_p6 = scmp.lt.u32.totalorder %s98_s22, %s169_s3 }
 0x13a   :  { %p104_p7 = pnand %p102_p6, %p99_p5 }
 0x13c   :  { %107 = shalt.err (!%p104_p7)
}
 0x13d   :  { %s112_s27 = smov 64   ;;  %s113_s28 = smov 4  }
 0x13e   :  { %73 = dma.vmem_to_hbm [thread:$0]  %s68_s20, 128, %s169_s3, [#allocation3], %s112_s27, %s112_s27, %s113_s28  }
 0x13f   :  { %108 = dma.done.wait [#allocation3], 128  }
 0x140   :  { %109 = vsyncadd [#allocation3], 4294967168 }
 0x141   :  { %77 = vsyncpa [#allocation3], 1 }

</bundles_post_ra>
